<compile_context>
chip_gen: v7x
topology: tpu7x:2x2x1
jax: 0.10.0
libtpu: 0.0.40
codegen_flags: <defaults>
</compile_context>

<pallas_src>
import jax
import jax.numpy as jnp
from jax.experimental import pallas as pl
from jax.experimental.pallas import tpu as pltpu

N_NODES = 8      # num_nodes
N_EDGES = 16     # M
NODE_DIM = 32    # num_node_features
EDGE_DIM = 16    # num_edge_features
HIDDEN = 64      # hidden width of both MLPs


# ---------------------------------------------------------------------------
# Fused MetaLayer kernel: edge MLP -> per-edge message MLP -> scatter_mean ->
# per-node update MLP, all in VMEM in one invocation.
# ---------------------------------------------------------------------------
def meta_layer_kernel(row_m1_ref, col_m1_ref, col_1m_ref, x_ref, e_ref,
                      we1s_ref, we1d_ref, we1e_ref, be1_ref, we2_ref, be2_ref,
                      wn1x_ref, wn1e_ref, bn1_ref, wn2_ref, bn2_ref,
                      wn3x_ref, wn3a_ref, bn3_ref, wn4_ref, bn4_ref,
                      x_out_ref, e_out_ref):
    f32 = jnp.float32
    x = x_ref[...]                                            # (N, NODE_DIM) f32
    e = e_ref[...]                                            # (M, EDGE_DIM) f32

    def dotw(a, w_ref):
        # weights stored bf16 (halves HBM->VMEM weight traffic); f32 accumulate
        return jnp.dot(a, w_ref[...].astype(f32), preferred_element_type=f32)

    # ---- in-kernel gather x[row], x[col]: one-hot selection matmuls (MXU) --
    iota_mn = jax.lax.broadcasted_iota(jnp.int32, (N_EDGES, N_NODES), 1)
    g_row = (row_m1_ref[...] == iota_mn).astype(f32)          # (M, N)
    g_col = (col_m1_ref[...] == iota_mn).astype(f32)          # (M, N)
    x_row = jnp.dot(g_row, x, preferred_element_type=f32)     # x[row]  (M, NODE_DIM)
    x_col = jnp.dot(g_col, x, preferred_element_type=f32)     # x[col]  (M, NODE_DIM)

    # ---- edge model: Lin(2*Fn+Fe -> H) . ReLU . Lin(H -> Fe) ---------------
    h = (dotw(x_row, we1s_ref) + dotw(x_col, we1d_ref)
         + dotw(e, we1e_ref) + be1_ref[...])
    h = jnp.maximum(h, 0.0)
    e_new = dotw(h, we2_ref) + be2_ref[...]                   # (M, EDGE_DIM)
    e_out_ref[...] = e_new

    # ---- node model, per-edge message MLP ----------------------------------
    h1 = dotw(x_row, wn1x_ref) + dotw(e_new, wn1e_ref) + bn1_ref[...]
    h1 = jnp.maximum(h1, 0.0)
    msg = dotw(h1, wn2_ref) + bn2_ref[...]                    # (M, NODE_DIM)

    # ---- scatter_mean over target nodes (col) as dense [N,M] @ [M,F] -------
    iota_nm = jax.lax.broadcasted_iota(jnp.int32, (N_NODES, N_EDGES), 0)
    onehot = (col_1m_ref[...] == iota_nm).astype(f32)         # (N, M)
    counts = jnp.maximum(jnp.sum(onehot, axis=1, keepdims=True), 1.0)
    agg = jnp.dot(onehot / counts, msg, preferred_element_type=f32)  # (N, NODE_DIM)

    # ---- node model, per-node update MLP -----------------------------------
    h2 = dotw(x, wn3x_ref) + dotw(agg, wn3a_ref) + bn3_ref[...]
    h2 = jnp.maximum(h2, 0.0)
    x_out_ref[...] = dotw(h2, wn4_ref) + bn4_ref[...]


# ---------------------------------------------------------------------------
# Wrapper
# ---------------------------------------------------------------------------
def _cost_estimate(args, out_bytes):
    flops = 2 * (
        2 * N_EDGES * N_NODES * NODE_DIM                    # one-hot gathers
        + N_EDGES * (2 * NODE_DIM + EDGE_DIM) * HIDDEN      # edge MLP layer 1
        + N_EDGES * HIDDEN * EDGE_DIM                       # edge MLP layer 2
        + N_EDGES * (NODE_DIM + EDGE_DIM) * HIDDEN          # node MLP1 layer 1
        + N_EDGES * HIDDEN * NODE_DIM                       # node MLP1 layer 2
        + N_NODES * N_EDGES * NODE_DIM                      # scatter_mean matmul
        + N_NODES * (2 * NODE_DIM) * HIDDEN                 # node MLP2 layer 1
        + N_NODES * HIDDEN * NODE_DIM)                      # node MLP2 layer 2
    bytes_accessed = sum(int(a.size) * a.dtype.itemsize for a in args) + out_bytes
    return pl.CostEstimate(flops=flops, transcendentals=0,
                           bytes_accessed=bytes_accessed)


def meta_layer_forward(x, edge_index, edge_attr, p):
    """Fused Pallas MetaLayer forward: (x, edge_index, edge_attr) -> (x', e')."""
    row = edge_index[0].astype(jnp.int32)
    col = edge_index[1].astype(jnp.int32)
    row_m1 = row.reshape(N_EDGES, 1)        # for gather one-hot  (M, 1)
    col_m1 = col.reshape(N_EDGES, 1)        # for gather one-hot  (M, 1)
    col_1m = col.reshape(1, N_EDGES)        # for scatter one-hot (1, M)

    args = (row_m1, col_m1, col_1m, x, edge_attr,
            p["we1s"], p["we1d"], p["we1e"], p["be1"], p["we2"], p["be2"],
            p["wn1x"], p["wn1e"], p["bn1"], p["wn2"], p["bn2"],
            p["wn3x"], p["wn3a"], p["bn3"], p["wn4"], p["bn4"])

    out_shapes = (jax.ShapeDtypeStruct((N_NODES, NODE_DIM), jnp.float32),
                  jax.ShapeDtypeStruct((N_EDGES, EDGE_DIM), jnp.float32))
    out_bytes = sum(s.dtype.itemsize * N_NODES * NODE_DIM for s in out_shapes[:1]) \
        + 4 * N_EDGES * EDGE_DIM

    x_new, e_new = pl.pallas_call(
        meta_layer_kernel,
        out_shape=out_shapes,
        in_specs=[pl.BlockSpec(memory_space=pltpu.MemorySpace.VMEM) for _ in args],
        out_specs=(pl.BlockSpec(memory_space=pltpu.MemorySpace.VMEM),
                   pl.BlockSpec(memory_space=pltpu.MemorySpace.VMEM)),
        cost_estimate=_cost_estimate(args, out_bytes),
    )(*args)
    return x_new, e_new


# ---------------------------------------------------------------------------
# Pure-JAX reference (same math, same bf16 weight values) for correctness
# ---------------------------------------------------------------------------
def meta_layer_reference(x, edge_index, edge_attr, p):
    W = lambda k: p[k].astype(jnp.float32)
    row, col = edge_index[0], edge_index[1]
    src, dst = x[row], x[col]
    h = jnp.maximum(src @ W("we1s") + dst @ W("we1d")
                    + edge_attr @ W("we1e") + p["be1"], 0.0)
    e_new = h @ W("we2") + p["be2"]

    h1 = jnp.maximum(src @ W("wn1x") + e_new @ W("wn1e") + p["bn1"], 0.0)
    msg = h1 @ W("wn2") + p["bn2"]
    onehot = (col[None, :] == jnp.arange(N_NODES)[:, None]).astype(jnp.float32)
    counts = jnp.maximum(onehot.sum(axis=1, keepdims=True), 1.0)
    agg = (onehot / counts) @ msg
    h2 = jnp.maximum(x @ W("wn3x") + agg @ W("wn3a") + p["bn3"], 0.0)
    x_new = h2 @ W("wn4") + p["bn4"]
    return x_new, e_new


def init_params(key):
    def lin(k, fan_in, fan_out):
        kw, kb = jax.random.split(k)
        scale = 1.0 / jnp.sqrt(fan_in)
        w = jax.random.uniform(kw, (fan_in, fan_out), jnp.float32, -scale, scale)
        b = jax.random.uniform(kb, (1, fan_out), jnp.float32, -scale, scale)
        # weights in bf16 (memory-bound layer); biases stay f32
        return w.astype(jnp.bfloat16), b

    ks = jax.random.split(key, 6)
    we1, be1 = lin(ks[0], 2 * NODE_DIM + EDGE_DIM, HIDDEN)   # edge MLP l1
    we2, be2 = lin(ks[1], HIDDEN, EDGE_DIM)                  # edge MLP l2
    wn1, bn1 = lin(ks[2], NODE_DIM + EDGE_DIM, HIDDEN)       # node MLP1 l1
    wn2, bn2 = lin(ks[3], HIDDEN, NODE_DIM)                  # node MLP1 l2
    wn3, bn3 = lin(ks[4], 2 * NODE_DIM, HIDDEN)              # node MLP2 l1
    wn4, bn4 = lin(ks[5], HIDDEN, NODE_DIM)                  # node MLP2 l2

    return {
        # edge MLP first layer split by input block (src | dst | edge_attr)
        "we1s": we1[:NODE_DIM], "we1d": we1[NODE_DIM:2 * NODE_DIM],
        "we1e": we1[2 * NODE_DIM:], "be1": be1,
        "we2": we2, "be2": be2,
        # node MLP1 first layer split (x[row] | edge_attr_new)
        "wn1x": wn1[:NODE_DIM], "wn1e": wn1[NODE_DIM:], "bn1": bn1,
        "wn2": wn2, "bn2": bn2,
        # node MLP2 first layer split (x | agg)
        "wn3x": wn3[:NODE_DIM], "wn3a": wn3[NODE_DIM:], "bn3": bn3,
        "wn4": wn4, "bn4": bn4,
    }


if __name__ == "__main__":
    key = jax.random.PRNGKey(0)
    k_x, k_e, k_ei, k_p = jax.random.split(key, 4)

    x = jax.random.normal(k_x, (N_NODES, NODE_DIM), jnp.float32)
    edge_attr = jax.random.normal(k_e, (N_EDGES, EDGE_DIM), jnp.float32)
    edge_index = jax.random.randint(k_ei, (2, N_EDGES), 0, N_NODES, jnp.int32)
    params = init_params(k_p)

    x_new, e_new = meta_layer_forward(x, edge_index, edge_attr, params)
    jax.block_until_ready((x_new, e_new))

    x_ref, e_ref = meta_layer_reference(x, edge_index, edge_attr, params)
    assert jnp.allclose(x_new, x_ref, rtol=1e-3, atol=1e-3)
    assert jnp.allclose(e_new, e_ref, rtol=1e-3, atol=1e-3)

    print("KERNEL_OK")
</pallas_src>

<mosaic_0001>
module attributes {stable_mosaic.version = 11 : i64} {
  func.func @meta_layer_kernel(%arg0: memref<16x1xi32, #tpu.memory_space<vmem>>, %arg1: memref<16x1xi32, #tpu.memory_space<vmem>>, %arg2: memref<1x16xi32, #tpu.memory_space<vmem>>, %arg3: memref<8x32xf32, #tpu.memory_space<vmem>>, %arg4: memref<16x16xf32, #tpu.memory_space<vmem>>, %arg5: memref<32x64xbf16, #tpu.memory_space<vmem>>, %arg6: memref<32x64xbf16, #tpu.memory_space<vmem>>, %arg7: memref<16x64xbf16, #tpu.memory_space<vmem>>, %arg8: memref<1x64xf32, #tpu.memory_space<vmem>>, %arg9: memref<64x16xbf16, #tpu.memory_space<vmem>>, %arg10: memref<1x16xf32, #tpu.memory_space<vmem>>, %arg11: memref<32x64xbf16, #tpu.memory_space<vmem>>, %arg12: memref<16x64xbf16, #tpu.memory_space<vmem>>, %arg13: memref<1x64xf32, #tpu.memory_space<vmem>>, %arg14: memref<64x32xbf16, #tpu.memory_space<vmem>>, %arg15: memref<1x32xf32, #tpu.memory_space<vmem>>, %arg16: memref<32x64xbf16, #tpu.memory_space<vmem>>, %arg17: memref<32x64xbf16, #tpu.memory_space<vmem>>, %arg18: memref<1x64xf32, #tpu.memory_space<vmem>>, %arg19: memref<64x32xbf16, #tpu.memory_space<vmem>>, %arg20: memref<1x32xf32, #tpu.memory_space<vmem>>, %arg21: memref<8x32xf32, #tpu.memory_space<vmem>>, %arg22: memref<16x16xf32, #tpu.memory_space<vmem>>) attributes {dimension_semantics = [], scalar_prefetch = 0 : i64, scratch_operands = 0 : i64, tpu.core_type = #tpu.core_type<tc>} {
    %c0 = arith.constant 0 : index
    %c0_0 = arith.constant 0 : index
    %0 = vector.load %arg3[%c0, %c0_0] : memref<8x32xf32, #tpu.memory_space<vmem>>, vector<8x32xf32>
    %c0_1 = arith.constant 0 : index
    %c0_2 = arith.constant 0 : index
    %1 = vector.load %arg4[%c0_1, %c0_2] : memref<16x16xf32, #tpu.memory_space<vmem>>, vector<16x16xf32>
    %2 = tpu.iota {dimensions = array<i32: 1>} : vector<16x8xi32>
    %c0_3 = arith.constant 0 : index
    %c0_4 = arith.constant 0 : index
    %3 = vector.load %arg0[%c0_3, %c0_4] : memref<16x1xi32, #tpu.memory_space<vmem>>, vector<16x1xi32>
    %4 = vector.broadcast %3 : vector<16x1xi32> to vector<16x8xi32>
    %5 = arith.cmpi eq, %4, %2 : vector<16x8xi32>
    %6 = arith.extui %5 : vector<16x8xi1> to vector<16x8xi32>
    %7 = arith.sitofp %6 : vector<16x8xi32> to vector<16x8xf32>
    %c0_5 = arith.constant 0 : index
    %c0_6 = arith.constant 0 : index
    %8 = vector.load %arg1[%c0_5, %c0_6] : memref<16x1xi32, #tpu.memory_space<vmem>>, vector<16x1xi32>
    %9 = vector.broadcast %8 : vector<16x1xi32> to vector<16x8xi32>
    %10 = arith.cmpi eq, %9, %2 : vector<16x8xi32>
    %11 = arith.extui %10 : vector<16x8xi1> to vector<16x8xi32>
    %12 = arith.sitofp %11 : vector<16x8xi32> to vector<16x8xf32>
    %cst = arith.constant dense<0.000000e+00> : vector<16x32xf32>
    %13 = tpu.matmul %7, %0, %cst {dimension_numbers = #tpu.dot_dimension_numbers<[1], [0], [0], [1], [0, 0, 1, 1], [], []>} : vector<16x8xf32>, vector<8x32xf32>, vector<16x32xf32> -> vector<16x32xf32>
    %cst_7 = arith.constant dense<0.000000e+00> : vector<16x32xf32>
    %14 = tpu.matmul %12, %0, %cst_7 {dimension_numbers = #tpu.dot_dimension_numbers<[1], [0], [0], [1], [0, 0, 1, 1], [], []>} : vector<16x8xf32>, vector<8x32xf32>, vector<16x32xf32> -> vector<16x32xf32>
    %c0_8 = arith.constant 0 : index
    %c0_9 = arith.constant 0 : index
    %15 = vector.load %arg5[%c0_8, %c0_9] : memref<32x64xbf16, #tpu.memory_space<vmem>>, vector<32x64xbf16>
    %16 = arith.extf %15 : vector<32x64xbf16> to vector<32x64xf32>
    %cst_10 = arith.constant dense<0.000000e+00> : vector<16x64xf32>
    %17 = tpu.matmul %13, %16, %cst_10 {dimension_numbers = #tpu.dot_dimension_numbers<[1], [0], [0], [1], [0, 0, 1, 1], [], []>} : vector<16x32xf32>, vector<32x64xf32>, vector<16x64xf32> -> vector<16x64xf32>
    %c0_11 = arith.constant 0 : index
    %c0_12 = arith.constant 0 : index
    %18 = vector.load %arg6[%c0_11, %c0_12] : memref<32x64xbf16, #tpu.memory_space<vmem>>, vector<32x64xbf16>
    %19 = arith.extf %18 : vector<32x64xbf16> to vector<32x64xf32>
    %cst_13 = arith.constant dense<0.000000e+00> : vector<16x64xf32>
    %20 = tpu.matmul %14, %19, %cst_13 {dimension_numbers = #tpu.dot_dimension_numbers<[1], [0], [0], [1], [0, 0, 1, 1], [], []>} : vector<16x32xf32>, vector<32x64xf32>, vector<16x64xf32> -> vector<16x64xf32>
    %21 = arith.addf %17, %20 : vector<16x64xf32>
    %c0_14 = arith.constant 0 : index
    %c0_15 = arith.constant 0 : index
    %22 = vector.load %arg7[%c0_14, %c0_15] : memref<16x64xbf16, #tpu.memory_space<vmem>>, vector<16x64xbf16>
    %23 = arith.extf %22 : vector<16x64xbf16> to vector<16x64xf32>
    %cst_16 = arith.constant dense<0.000000e+00> : vector<16x64xf32>
    %24 = tpu.matmul %1, %23, %cst_16 {dimension_numbers = #tpu.dot_dimension_numbers<[1], [0], [0], [1], [0, 0, 1, 1], [], []>} : vector<16x16xf32>, vector<16x64xf32>, vector<16x64xf32> -> vector<16x64xf32>
    %25 = arith.addf %21, %24 : vector<16x64xf32>
    %c0_17 = arith.constant 0 : index
    %c0_18 = arith.constant 0 : index
    %26 = vector.load %arg8[%c0_17, %c0_18] : memref<1x64xf32, #tpu.memory_space<vmem>>, vector<1x64xf32>
    %27 = vector.broadcast %26 : vector<1x64xf32> to vector<16x64xf32>
    %28 = arith.addf %25, %27 : vector<16x64xf32>
    %cst_19 = arith.constant 0.000000e+00 : f32
    %29 = vector.broadcast %cst_19 : f32 to vector<16x64xf32>
    %30 = arith.maximumf %28, %29 : vector<16x64xf32>
    %c0_20 = arith.constant 0 : index
    %c0_21 = arith.constant 0 : index
    %31 = vector.load %arg9[%c0_20, %c0_21] : memref<64x16xbf16, #tpu.memory_space<vmem>>, vector<64x16xbf16>
    %32 = arith.extf %31 : vector<64x16xbf16> to vector<64x16xf32>
    %cst_22 = arith.constant dense<0.000000e+00> : vector<16x16xf32>
    %33 = tpu.matmul %30, %32, %cst_22 {dimension_numbers = #tpu.dot_dimension_numbers<[1], [0], [0], [1], [0, 0, 1, 1], [], []>} : vector<16x64xf32>, vector<64x16xf32>, vector<16x16xf32> -> vector<16x16xf32>
    %c0_23 = arith.constant 0 : index
    %c0_24 = arith.constant 0 : index
    %34 = vector.load %arg10[%c0_23, %c0_24] : memref<1x16xf32, #tpu.memory_space<vmem>>, vector<1x16xf32>
    %35 = vector.broadcast %34 : vector<1x16xf32> to vector<16x16xf32>
    %36 = arith.addf %33, %35 : vector<16x16xf32>
    %c0_25 = arith.constant 0 : index
    %c0_26 = arith.constant 0 : index
    %37 = vector.load %arg22[%c0_25, %c0_26] : memref<16x16xf32, #tpu.memory_space<vmem>>, vector<16x16xf32>
    tpu.vector_store %arg22[%c0_25, %c0_26], %36 {strides = array<i32>} : memref<16x16xf32, #tpu.memory_space<vmem>>, vector<16x16xf32>,
    %c0_27 = arith.constant 0 : index
    %c0_28 = arith.constant 0 : index
    %38 = vector.load %arg11[%c0_27, %c0_28] : memref<32x64xbf16, #tpu.memory_space<vmem>>, vector<32x64xbf16>
    %39 = arith.extf %38 : vector<32x64xbf16> to vector<32x64xf32>
    %cst_29 = arith.constant dense<0.000000e+00> : vector<16x64xf32>
    %40 = tpu.matmul %13, %39, %cst_29 {dimension_numbers = #tpu.dot_dimension_numbers<[1], [0], [0], [1], [0, 0, 1, 1], [], []>} : vector<16x32xf32>, vector<32x64xf32>, vector<16x64xf32> -> vector<16x64xf32>
    %c0_30 = arith.constant 0 : index
    %c0_31 = arith.constant 0 : index
    %41 = vector.load %arg12[%c0_30, %c0_31] : memref<16x64xbf16, #tpu.memory_space<vmem>>, vector<16x64xbf16>
    %42 = arith.extf %41 : vector<16x64xbf16> to vector<16x64xf32>
    %cst_32 = arith.constant dense<0.000000e+00> : vector<16x64xf32>
    %43 = tpu.matmul %36, %42, %cst_32 {dimension_numbers = #tpu.dot_dimension_numbers<[1], [0], [0], [1], [0, 0, 1, 1], [], []>} : vector<16x16xf32>, vector<16x64xf32>, vector<16x64xf32> -> vector<16x64xf32>
    %44 = arith.addf %40, %43 : vector<16x64xf32>
    %c0_33 = arith.constant 0 : index
    %c0_34 = arith.constant 0 : index
    %45 = vector.load %arg13[%c0_33, %c0_34] : memref<1x64xf32, #tpu.memory_space<vmem>>, vector<1x64xf32>
    %46 = vector.broadcast %45 : vector<1x64xf32> to vector<16x64xf32>
    %47 = arith.addf %44, %46 : vector<16x64xf32>
    %cst_35 = arith.constant 0.000000e+00 : f32
    %48 = vector.broadcast %cst_35 : f32 to vector<16x64xf32>
    %49 = arith.maximumf %47, %48 : vector<16x64xf32>
    %c0_36 = arith.constant 0 : index
    %c0_37 = arith.constant 0 : index
    %50 = vector.load %arg14[%c0_36, %c0_37] : memref<64x32xbf16, #tpu.memory_space<vmem>>, vector<64x32xbf16>
    %51 = arith.extf %50 : vector<64x32xbf16> to vector<64x32xf32>
    %cst_38 = arith.constant dense<0.000000e+00> : vector<16x32xf32>
    %52 = tpu.matmul %49, %51, %cst_38 {dimension_numbers = #tpu.dot_dimension_numbers<[1], [0], [0], [1], [0, 0, 1, 1], [], []>} : vector<16x64xf32>, vector<64x32xf32>, vector<16x32xf32> -> vector<16x32xf32>
    %c0_39 = arith.constant 0 : index
    %c0_40 = arith.constant 0 : index
    %53 = vector.load %arg15[%c0_39, %c0_40] : memref<1x32xf32, #tpu.memory_space<vmem>>, vector<1x32xf32>
    %54 = vector.broadcast %53 : vector<1x32xf32> to vector<16x32xf32>
    %55 = arith.addf %52, %54 : vector<16x32xf32>
    %56 = tpu.iota {dimensions = array<i32: 0>} : vector<8x16xi32>
    %c0_41 = arith.constant 0 : index
    %c0_42 = arith.constant 0 : index
    %57 = vector.load %arg2[%c0_41, %c0_42] : memref<1x16xi32, #tpu.memory_space<vmem>>, vector<1x16xi32>
    %58 = vector.broadcast %57 : vector<1x16xi32> to vector<8x16xi32>
    %59 = arith.cmpi eq, %58, %56 : vector<8x16xi32>
    %60 = arith.extui %59 : vector<8x16xi1> to vector<8x16xi32>
    %61 = arith.sitofp %60 : vector<8x16xi32> to vector<8x16xf32>
    %cst_43 = arith.constant dense<0.000000e+00> : vector<8xf32>
    %62 = vector.multi_reduction <add>, %61, %cst_43 [1] : vector<8x16xf32> to vector<8xf32>
    %63 = vector.shape_cast %62 : vector<8xf32> to vector<8x1xf32>
    %cst_44 = arith.constant 1.000000e+00 : f32
    %64 = vector.broadcast %cst_44 : f32 to vector<8x1xf32>
    %65 = arith.maximumf %63, %64 : vector<8x1xf32>
    %66 = vector.broadcast %65 : vector<8x1xf32> to vector<8x16xf32>
    %67 = arith.divf %61, %66 : vector<8x16xf32>
    %cst_45 = arith.constant dense<0.000000e+00> : vector<8x32xf32>
    %68 = tpu.matmul %67, %55, %cst_45 {dimension_numbers = #tpu.dot_dimension_numbers<[1], [0], [0], [1], [0, 0, 1, 1], [], []>} : vector<8x16xf32>, vector<16x32xf32>, vector<8x32xf32> -> vector<8x32xf32>
    %c0_46 = arith.constant 0 : index
    %c0_47 = arith.constant 0 : index
    %69 = vector.load %arg16[%c0_46, %c0_47] : memref<32x64xbf16, #tpu.memory_space<vmem>>, vector<32x64xbf16>
    %70 = arith.extf %69 : vector<32x64xbf16> to vector<32x64xf32>
    %cst_48 = arith.constant dense<0.000000e+00> : vector<8x64xf32>
    %71 = tpu.matmul %0, %70, %cst_48 {dimension_numbers = #tpu.dot_dimension_numbers<[1], [0], [0], [1], [0, 0, 1, 1], [], []>} : vector<8x32xf32>, vector<32x64xf32>, vector<8x64xf32> -> vector<8x64xf32>
    %c0_49 = arith.constant 0 : index
    %c0_50 = arith.constant 0 : index
    %72 = vector.load %arg17[%c0_49, %c0_50] : memref<32x64xbf16, #tpu.memory_space<vmem>>, vector<32x64xbf16>
    %73 = arith.extf %72 : vector<32x64xbf16> to vector<32x64xf32>
    %cst_51 = arith.constant dense<0.000000e+00> : vector<8x64xf32>
    %74 = tpu.matmul %68, %73, %cst_51 {dimension_numbers = #tpu.dot_dimension_numbers<[1], [0], [0], [1], [0, 0, 1, 1], [], []>} : vector<8x32xf32>, vector<32x64xf32>, vector<8x64xf32> -> vector<8x64xf32>
    %75 = arith.addf %71, %74 : vector<8x64xf32>
    %c0_52 = arith.constant 0 : index
    %c0_53 = arith.constant 0 : index
    %76 = vector.load %arg18[%c0_52, %c0_53] : memref<1x64xf32, #tpu.memory_space<vmem>>, vector<1x64xf32>
    %77 = vector.broadcast %76 : vector<1x64xf32> to vector<8x64xf32>
    %78 = arith.addf %75, %77 : vector<8x64xf32>
    %cst_54 = arith.constant 0.000000e+00 : f32
    %79 = vector.broadcast %cst_54 : f32 to vector<8x64xf32>
    %80 = arith.maximumf %78, %79 : vector<8x64xf32>
    %c0_55 = arith.constant 0 : index
    %c0_56 = arith.constant 0 : index
    %81 = vector.load %arg19[%c0_55, %c0_56] : memref<64x32xbf16, #tpu.memory_space<vmem>>, vector<64x32xbf16>
    %82 = arith.extf %81 : vector<64x32xbf16> to vector<64x32xf32>
    %cst_57 = arith.constant dense<0.000000e+00> : vector<8x32xf32>
    %83 = tpu.matmul %80, %82, %cst_57 {dimension_numbers = #tpu.dot_dimension_numbers<[1], [0], [0], [1], [0, 0, 1, 1], [], []>} : vector<8x64xf32>, vector<64x32xf32>, vector<8x32xf32> -> vector<8x32xf32>
    %c0_58 = arith.constant 0 : index
    %c0_59 = arith.constant 0 : index
    %84 = vector.load %arg20[%c0_58, %c0_59] : memref<1x32xf32, #tpu.memory_space<vmem>>, vector<1x32xf32>
    %85 = vector.broadcast %84 : vector<1x32xf32> to vector<8x32xf32>
    %86 = arith.addf %83, %85 : vector<8x32xf32>
    %c0_60 = arith.constant 0 : index
    %c0_61 = arith.constant 0 : index
    %87 = vector.load %arg21[%c0_60, %c0_61] : memref<8x32xf32, #tpu.memory_space<vmem>>, vector<8x32xf32>
    tpu.vector_store %arg21[%c0_60, %c0_61], %86 {strides = array<i32>} : memref<8x32xf32, #tpu.memory_space<vmem>>, vector<8x32xf32>,
    return
  }
}

</mosaic_0001>

<bundles_post_ra>
// kernel: tpu_custom_call.1
= control target key start
LH: loop header
LB: loop body
LE: loop exit
PB: predicated region body
PF: predicated region fallthrough
CT: control target
= control target key end

     0   :  { %s2150_s0 = inlined_call_operand.vmem [shape: s32[16,1], index: 0, kind: input, shape index: {}]   ;;  %s2151_s1 = inlined_call_operand.vmem [shape: s32[16,1], index: 1, kind: input, shape index: {}]   ;;  %s2152_s2 = inlined_call_operand.vmem [shape: s32[1,16], index: 2, kind: input, shape index: {}]   ;;  %s2153_s3 = inlined_call_operand.vmem [shape: f32[8,32], index: 3, kind: input, shape index: {}]   ;;  %s2154_s4 = inlined_call_operand.vmem [shape: f32[16,16], index: 4, kind: input, shape index: {}]   ;;  %s2155_s5 = inlined_call_operand.vmem [shape: bf16[32,64], index: 5, kind: input, shape index: {}]   ;;  %s2156_s6 = inlined_call_operand.vmem [shape: bf16[32,64], index: 6, kind: input, shape index: {}]   ;;  %s2157_s7 = inlined_call_operand.vmem [shape: bf16[16,64], index: 7, kind: input, shape index: {}]   ;;  %s2158_s8 = inlined_call_operand.vmem [shape: f32[1,64], index: 8, kind: input, shape index: {}]   ;;  %s2159_s9 = inlined_call_operand.vmem [shape: bf16[64,16], index: 9, kind: input, shape index: {}]   ;;  %s2160_s10 = inlined_call_operand.vmem [shape: f32[1,16], index: 10, kind: input, shape index: {}]   ;;  %s2161_s11 = inlined_call_operand.vmem [shape: bf16[32,64], index: 11, kind: input, shape index: {}]   ;;  %s2162_s12 = inlined_call_operand.vmem [shape: bf16[16,64], index: 12, kind: input, shape index: {}]   ;;  %s2163_s13 = inlined_call_operand.vmem [shape: f32[1,64], index: 13, kind: input, shape index: {}]   ;;  %s2164_s14 = inlined_call_operand.vmem [shape: bf16[64,32], index: 14, kind: input, shape index: {}]   ;;  %s2165_s15 = inlined_call_operand.vmem [shape: f32[1,32], index: 15, kind: input, shape index: {}]   ;;  %s2166_s16 = inlined_call_operand.vmem [shape: bf16[32,64], index: 16, kind: input, shape index: {}]   ;;  %s2167_s17 = inlined_call_operand.vmem [shape: bf16[32,64], index: 17, kind: input, shape index: {}]   ;;  %s2168_s18 = inlined_call_operand.vmem [shape: f32[1,64], index: 18, kind: input, shape index: {}]   ;;  %s2169_s19 = inlined_call_operand.vmem [shape: bf16[64,32], index: 19, kind: input, shape index: {}]   ;;  %s2170_s20 = inlined_call_operand.vmem [shape: f32[1,32], index: 20, kind: input, shape index: {}]   ;;  %s2171_s21 = inlined_call_operand.hbm [shape: f32[8,32], index: 21, kind: output, shape index: {0}]   ;;  %s2172_s22 = inlined_call_operand.hbm [shape: f32[16,16], index: 22, kind: output, shape index: {1}]  }
   0x1   :  { %2178 = sst [smem:[#allocation8_spill]] %s2150_s0 }
   0x2   :  { %2179 = sst [smem:[#allocation9_spill]] %s2151_s1 }
   0x3   :  { %2180 = sst [smem:[#allocation10_spill]] %s2152_s2 }
   0x4   :  { %2181 = sst [smem:[#allocation11_spill]] %s2153_s3 }
   0x5   :  { %2182 = sst [smem:[#allocation12_spill]] %s2154_s4 }
   0x6   :  { %2183 = sst [smem:[#allocation13_spill]] %s2155_s5 }
   0x7   :  { %2184 = sst [smem:[#allocation14_spill]] %s2156_s6 }
   0x8   :  { %28 = vsyncpa [#allocation3], 0  ;;  %s2185_s29 = sld [smem:[#allocation9_spill]]  ;;  %s2186_s0 = sld [smem:[#allocation8_spill]]  ;;  %v1841_v2 = vmov 0  }
   0x9   :  { %1789 = vset.pattern.permute.xlu0 %v1841_v2  ;;  %1790 = vset.pattern.permute.xlu1 %v1841_v2 }
   0xe   :  { %v91_v0 = vld [vmem:[%s2185_s29] sm:$0xff] }
   0xf   :  { %v77_v1 = vld [vmem:[%s2186_s0] sm:$0xff] }
  0x10   :  { %29 = vsyncpa [#allocation5], 0  ;;  %94 = vperm.xlu0 %1789, %v91_v0   ;;  %80 = vperm.xlu1 %1790, %v77_v1   ;;  %v92_v3 = vld [vmem:[%s2185_s29 + $0x8] sm:$0xff]  ;;  %s2187_s26 = sld [smem:[#allocation11_spill]]  ;;  %s2188_s3 = sld [smem:[#allocation14_spill]]  ;;  %v75_v7 = vlaneseq  ;;  %vm105_vm0 = vcmask 64512  }
  0x11   :  { %v78_v4 = vld [vmem:[%s2186_s0 + $0x8] sm:$0xff]  ;;  %v1842_v11 = vmov 0.0   ;;  %s2189_s0 = sld [smem:[#allocation13_spill]]  ;;  %v1378_v20 = vld [vmem:[%s2159_s9] sm:$0xff]   ;;  %v1456_v22 = vld [vmem:[%s2159_s9 + $0x10] sm:$0xff]   ;;  %vm284_vm5 = vcmask 261120  }
  0x12   :  { %v76_v8 = vand.u32 127, %v75_v7  ;;  %v1455_v21 = vld [vmem:[%s2159_s9 + $0x8] sm:$0xff]   ;;  %v1374_v28 = vld [vmem:[%s2157_s7] sm:$0xff]   ;;  %s2190_s30 = sld [smem:[#allocation12_spill]]  ;;  %vm451_vm6 = vcmask 130048   ;;  %v1457_v31 = vld [vmem:[%s2159_s9 + $0x18] sm:$0xff]  }
  0x13   :  { %v1394_v32 = vld [vmem:[%s2161_s11] sm:$0xff]   ;;  %vm569_vm7 = vcmask 523264   ;;  %v1458_v40 = vld [vmem:[%s2161_s11 + $0x8] sm:$0xff]   ;;  %v1460_v51 = vld [vmem:[%s2164_s14 + $0x10] sm:$0xff]   ;;  %v937_v53 = vshrl.u32 %v75_v7, 7  ;;  %s2191_s7 = sld [smem:[#allocation10_spill]] }
  0x14   :  { %97 = vperm.xlu0 %1789, %v92_v3   ;;  %83 = vperm.xlu1 %1790, %v78_v4   ;;  %v1337_v33 = vld [vmem:[%s2158_s8] ss:$0 sm:$0xff]  ;;  %v1459_v48 = vld [vmem:[%s2164_s14 + $0x8] sm:$0xff]   ;;  %v1461_v52 = vld [vmem:[%s2164_s14 + $0x18] sm:$0xff]   ;;  %v1843_v2 = vmov 0.0|0.0   ;;  %vm1844_vm9 = vmmov 0  }
  0x15   :  { %v1402_v41 = vld [vmem:[%s2162_s12] sm:$0xff]   ;;  %v1462_v4 = vld [vmem:[%s2166_s16 + $0x8] sm:$0xff]   ;;  %s1845_s4 = smov [#allocation4]  }
  0x16   :  { %v1979_v5 = vld [vmem:[%s2187_s26] sm:$0xff]  ;;  %v1454_v18 = vld [vmem:[%s2188_s3 + $0x8] sm:$0xff]  }
  0x17   :  { %1546 = vmatprep.subr.mxu1 %v1979_v5  ;;  %1541 = vmatprep.subr.mxu0 %v1979_v5  ;;  %v1366_v6 = vld [vmem:[%s2188_s3] sm:$0xff]   ;;  %v1453_v27 = vld [vmem:[%s2189_s0 + $0x8] sm:$0xff]  }
  0x18   :  { %1547 = vmatpush3.msra.mxu1 %v1979_v5  ;;  %1542 = vmatpush3.msra.mxu0 %v1979_v5  ;;  %v1358_v19 = vld [vmem:[%s2189_s0] sm:$0xff]   ;;  %v74_v30 = vld [vmem:[%s2190_s30 + $0x8] sm:$0xff]  ;;  %s1308_s0 = sshll.u32 %s1845_s4, 4  ;;  %s1309_s0 = int_to_ptr.vmem [resolvable:$true] %s1308_s0 }
  0x19   :  { %1685 = vmatprep.subr.bf16.mxu0 %v1366_v6  ;;  %1705 = vmatprep.subr.bf16.mxu1 %v1378_v20  ;;  %v73_v29 = vld [vmem:[%s2190_s30] sm:$0xff]  ;;  %s1793_s23 = scalar_lea.vmem %s1309_s0, 256  ;;  %p1798_p1 = scmp.lt.s32.totalorder %s1309_s0, %s1309_s0 }
  0x1a   :  { %v1406_v42 = vld [vmem:[%s2164_s14] sm:$0xff]   ;;  %p1794_p0 = scmp.ne.s32.totalorder %s1309_s0, %s1793_s23  ;;  %p1799_p2 = scmp.lt.s32.totalorder %s1793_s23, %s1793_s23 }
  0x1b   :  { %v1338_v43 = vld [vmem:[%s2160_s10] ss:$0 sm:$0xff] }
  0x1c   :  { %v1349_v54 = vld [vmem:[%s2191_s7] ss:$0 sm:$0xff]  ;;  %p1800_p3 = por %p1799_p2, %p1798_p1 }
  0x1d   :  { %vm943_vm8 = vcmp.eq.s32.totalorder %v1349_v54, %v937_v53  ;;  %v1345_v58 = vld [vmem:[%s2163_s13] ss:$0 sm:$0xff] }
  0x1e   :  { %v1350_v55 = vsel %vm943_vm8, 1.0, %v1842_v11  ;;  %v1422_v3 = vld [vmem:[%s2166_s16] sm:$0xff]   ;;  %p1801_p4 = pnand %p1800_p3, %p1794_p0 }
  0x1f   :  { %v946_v56 = vsel %vm451_vm6, %v1350_v55, 0.0 }
  0x33   :  { %947 = vadd.xlane.f32.xlu0 %v946_v56 }
  0x8f   :  { %v95_v9 = vpop.permute.xlu0 %94  ;;  %v81_v10 = vpop.permute.xlu1 %80 }
  0x90   :  { %vm99_vm1 = vcmp.eq.s32.totalorder %v95_v9, %v76_v8  ;;  %vm85_vm2 = vcmp.eq.s32.totalorder %v81_v10, %v76_v8 }
  0x91   :  { %v1325_v12 = vsel %vm99_vm1, 1.0, %v1842_v11  ;;  %v1323_v13 = vsel %vm85_vm2, 1.0, %v1842_v11 }
  0x92   :  { %1548 = vmatprep.mubr.msk.f32.mxu1 %vm105_vm0, %v1325_v12  ;;  %1543 = vmatprep.mubr.msk.f32.mxu0 %vm105_vm0, %v1323_v13 }
  0x93   :  { %v98_v14 = vpop.permute.xlu0 %97  ;;  %v84_v15 = vpop.permute.xlu1 %83 }
  0x94   :  { %vm100_vm3 = vcmp.eq.s32.totalorder %v98_v14, %v76_v8  ;;  %vm86_vm4 = vcmp.eq.s32.totalorder %v84_v15, %v76_v8  ;;  %v1346_v8 = vld [vmem:[%s2165_s15] ss:$0 sm:$0xff] }
  0x95   :  { %v1326_v16 = vsel %vm100_vm3, 1.0, %v1842_v11  ;;  %v1324_v17 = vsel %vm86_vm4, 1.0, %v1842_v11 }
  0x96   :  { %1549 = vmatmul.mubr.msk.f32.vlgmr.msra.gmra.mrb[0].mxu1 %vm105_vm0, %v1326_v16  ;;  %1544 = vmatmul.mubr.msk.f32.vlgmr.msra.gmra.mrb[0].mxu0 %vm105_vm0, %v1324_v17  ;;  %v1463_v17 = vld [vmem:[%s2167_s17 + $0x8] sm:$0xff]  }
  0x97   :  { %1687 = vmatpush3.bf16.msra.mxu0 %v1366_v6  ;;  %1707 = vmatpush3.bf16.msra.mxu1 %v1378_v20 }
  0x98   :  { %1689 = vmatprep.subr.bf16.mxu0 %v1454_v18  ;;  %1709 = vmatprep.subr.bf16.mxu1 %v1455_v21 }
  0x9b   :  { %1691 = vmatpush3.bf16.msra.mxu0 %v1454_v18  ;;  %1711 = vmatpush3.bf16.msra.mxu1 %v1455_v21  ;;  %v1438_v18 = vld [vmem:[%s2169_s19] sm:$0xff]   ;;  %v1464_v21 = vld [vmem:[%s2169_s19 + $0x8] sm:$0xff]  }
  0x9c   :  { %1693 = vmatprep.subr.bf16.mxu0 %v1358_v19  ;;  %1713 = vmatprep.subr.bf16.mxu1 %v1456_v22 }
  0x9f   :  { %1715 = vmatpush3.bf16.msra.mxu1 %v1456_v22 }
  0xa0   :  { %1717 = vmatprep.subr.bf16.mxu1 %v1457_v31 }
  0xa3   :  { %1719 = vmatpush3.bf16.msra.mxu1 %v1457_v31 }
  0xa4   :  { %1725 = vmatprep.subr.bf16.mxu1 %v1394_v32 }
  0xc0   :  { %v948_v6 = vpop.xlane.xlu0 %947 }
  0xc1   :  { %v949_v7 = vmax.f32 %v948_v6, 1.0 }
  0xc3   :  { %1791 = vrcp.f32 %v949_v7 }
  0xcd   :  { %v1792_v13 = vpop.eup %1791 }
  0xce   :  { %v951_v16 = vmul.f32 %v1792_v13, %v1350_v55 }
 0x169   :  { %v1550_v23 = vpop.f32.mrb[0].mxu1  ;;  %v1545_v24 = vpop.f32.mrb[0].mxu0 }
 0x16a   :  { %v259_v25 = vpop.f32.mrb[1].mxu1  ;;  %v178_v26 = vpop.f32.mrb[1].mxu0 }
 0x16b   :  { %1559 = vmatprep.mubr.msk.f32.mxu0 %vm284_vm5, %v259_v25  ;;  %v1466_v25 = vld [vmem:[%s2169_s19 + $0x18] sm:$0xff]  }
 0x16c   :  { %1560 = vmatmul.mubr.msk.f32.vlgmr.msra.gmra.mrb[2].mxu0 %vm284_vm5, %v1550_v23  ;;  %v1465_v23 = vld [vmem:[%s2169_s19 + $0x10] sm:$0xff]  }
 0x16d   :  { %1695 = vmatpush3.bf16.msra.mxu0 %v1358_v19  ;;  %1570 = vmatprep.mubr.msk.f32.mxu0 %vm284_vm5, %v178_v26 }
 0x16e   :  { %1697 = vmatprep.subr.bf16.mxu0 %v1453_v27 }
 0x171   :  { %1699 = vmatpush3.bf16.msra.mxu0 %v1453_v27 }
 0x172   :  { %1701 = vmatprep.subr.bf16.mxu0 %v1374_v28 }
 0x174   :  { %1571 = vmatmul.mubr.msk.f32.vlgmr.msra.gmra.mrb[2].mxu0 %vm284_vm5, %v1545_v24 }
 0x175   :  { %1703 = vmatpush3.bf16.msra.mxu0 %v1374_v28  ;;  %1577 = vmatprep.mubr.msk.f32.mxu0 %vm451_vm6, %v73_v29 }
 0x176   :  { %1721 = vmatprep.subr.bf16.mxu0 %v1402_v41 }
 0x17c   :  { %1578 = vmatmul.mubr.msk.f32.vlgmr.msra.gmra.mrb[2].mxu0 %vm451_vm6, %v74_v30 }
 0x17d   :  { %1723 = vmatpush3.bf16.msra.mxu0 %v1402_v41 }
 0x17e   :  { %1733 = vmatprep.subr.bf16.mxu0 %v1406_v42 }
 0x24f   :  { %v1579_v34 = vpop.f32.mrb[2].mxu0 }
 0x250   :  { %v543_v35 = vadd.f32 %v1579_v34, %v1337_v33  ;;  %v524_v36 = vpop.f32.mrb[3].mxu0 }
 0x251   :  { %v542_v37 = vadd.f32 %v1337_v33, %v524_v36 }
 0x252   :  { %v545_v39 = vmax.f32 %v543_v35, 0.0 }
 0x253   :  { %v544_v38 = vmax.f32 %v542_v37, 0.0 }
 0x255   :  { %1596 = vmatprep.mubr.msk.f32.mxu1 %vm569_vm7, %v544_v38 }
 0x256   :  { %1597 = vmatmul.mubr.msk.f32.vlgmr.msra.gmra.mrb[2].mxu1 %vm569_vm7, %v545_v39 }
 0x257   :  { %1727 = vmatpush3.bf16.msra.mxu1 %v1394_v32  ;;  %1614 = vmatprep.mubr.msk.f32.mxu1 %vm284_vm5, %v178_v26  ;;  %v1354_v26 = vld [vmem:[%s2168_s18] ss:$0 sm:$0xff] }
 0x258   :  { %1729 = vmatprep.subr.bf16.mxu1 %v1458_v40 }
 0x25b   :  { %1731 = vmatpush3.bf16.msra.mxu1 %v1458_v40 }
 0x25c   :  { %1748 = vmatprep.subr.bf16.mxu1 %v1843_v2 }
 0x25e   :  { %1615 = vmatmul.mubr.msk.f32.vlgmr.msra.gmra.mrb[4].mxu1 %vm284_vm5, %v1545_v24 }
 0x25f   :  { %1640 = vmatprep.mubr.msk.f32.mxu1 %vm1844_vm9, %v1842_v11 }
 0x329   :  { %v1598_v44 = vpop.f32.mrb[2].mxu1 }
 0x32a   :  { %v648_v45 = vadd.f32 %v1598_v44, %v1338_v43  ;;  %v642_v46 = vpop.f32.mrb[3].mxu1 }
 0x32b   :  { %v643_v47 = vadd.f32 %v1338_v43, %v642_v46 }
 0x32c   :  { %652 = vst.msk [vmem:[#allocation4 + $0x8] sm:$0xff] %vm451_vm6, %v648_v45 }
 0x32d   :  { %651 = vst.msk [vmem:[#allocation4] sm:$0xff] %vm451_vm6, %v643_v47  ;;  %1603 = vmatprep.mubr.msk.f32.mxu0 %vm451_vm6, %v643_v47 }
 0x32e   :  { %1604 = vmatmul.mubr.msk.f32.vlgmr.msra.gmra.mrb[4].mxu0 %vm451_vm6, %v648_v45 }
 0x32f   :  { %1735 = vmatpush3.bf16.msra.mxu0 %v1406_v42 }
 0x330   :  { %1737 = vmatprep.subr.bf16.mxu0 %v1459_v48 }
 0x331   :  { %v1616_v49 = vpop.f32.mrb[4].mxu1 }
 0x332   :  { %v812_v50 = vpop.f32.mrb[5].mxu1 }
 0x333   :  { %1739 = vmatpush3.bf16.msra.mxu0 %v1459_v48 }
 0x334   :  { %1741 = vmatprep.subr.bf16.mxu0 %v1460_v51 }
 0x337   :  { %1743 = vmatpush3.bf16.msra.mxu0 %v1460_v51 }
 0x338   :  { %1745 = vmatprep.subr.bf16.mxu0 %v1461_v52 }
 0x33b   :  { %1747 = vmatpush3.bf16.msra.mxu0 %v1461_v52 }
 0x33c   :  { %1757 = vmatprep.subr.bf16.mxu0 %v1843_v2 }
 0x401   :  { %v1605_v57 = vpop.f32.mrb[4].mxu0 }
 0x402   :  { %v818_v59 = vadd.f32 %v1616_v49, %v1605_v57  ;;  %v737_v60 = vpop.f32.mrb[5].mxu0 }
 0x403   :  { %v813_v61 = vadd.f32 %v812_v50, %v737_v60 }
 0x404   :  { %v829_v62 = vadd.f32 %v1345_v58, %v818_v59 }
 0x405   :  { %v828_v63 = vadd.f32 %v1345_v58, %v813_v61 }
 0x406   :  { %v831_v1 = vmax.f32 %v829_v62, 0.0 }
 0x407   :  { %v830_v0 = vmax.f32 %v828_v63, 0.0 }
 0x409   :  { %1633 = vmatprep.mubr.msk.f32.mxu0 %vm569_vm7, %v830_v0 }
 0x40a   :  { %1634 = vmatmul.mubr.msk.f32.vlgmr.msra.gmra.mrb[6].mxu0 %vm569_vm7, %v831_v1 }
 0x40b   :  { %1662 = vmatprep.mubr.msk.f32.mxu0 %vm1844_vm9, %v1842_v11  ;;  %1759 = vmatpush3.bf16.msra.mxu0 %v1422_v3 }
 0x40c   :  { %1760 = vmatprep.subr.bf16.mxu0 %v1843_v2 }
 0x40f   :  { %1762 = vmatpush3.bf16.msra.mxu0 %v1462_v4 }
 0x412   :  { %1663 = vmatmul.mubr.msk.f32.vlgmr.msra.gmra.mrb[8].mxu0 %vm284_vm5, %v1979_v5  ;;  %v1430_v5 = vld [vmem:[%s2167_s17] sm:$0xff]  }
 0x4dd   :  { %v1635_v9 = vpop.f32.mrb[6].mxu0 }
 0x4de   :  { %v933_v10 = vadd.f32 %v1635_v9, %v1346_v8  ;;  %v927_v12 = vpop.f32.mrb[7].mxu0 }
 0x4df   :  { %v928_v14 = vadd.f32 %v1346_v8, %v927_v12 }
 0x4e1   :  { %v1749_v15 = vpack.c.bf16 %v933_v10, %v928_v14 }
 0x4e3   :  { %1750 = vmatpush3.bf16.msra.mxu1 %v1749_v15 }
 0x4e4   :  { %1751 = vmatprep.subr.bf16.mxu1 %v1843_v2 }
 0x4e5   :  { %v1183_v22 = vpop.f32.mrb[8].mxu0 }
 0x4e6   :  { %1641 = vmatmul.mubr.msk.f32.vlgmr.msra.gmra.mrb[6].mxu1 %vm451_vm6, %v951_v16  ;;  %v1664_v24 = vpop.f32.mrb[9].mxu0 }
 0x4e7   :  { %1753 = vmatpush3.bf16.msra.mxu1 %v1430_v5  ;;  %1651 = vmatprep.mubr.msk.f32.mxu1 %vm1844_vm9, %v1842_v11 }
 0x4e8   :  { %1754 = vmatprep.subr.bf16.mxu1 %v1843_v2 }
 0x4eb   :  { %1756 = vmatpush3.bf16.msra.mxu1 %v1463_v17 }
 0x4ec   :  { %1763 = vmatprep.subr.bf16.mxu1 %v1843_v2 }
 0x5b9   :  { %v1021_v19 = vpop.f32.mrb[6].mxu1 }
 0x5ba   :  { %v1642_v20 = vpop.f32.mrb[7].mxu1  ;;  %1652 = vmatmul.mubr.msk.f32.vlgmr.msra.gmra.mrb[8].mxu1 %vm284_vm5, %v1021_v19 }
 0x5bb   :  { %1765 = vmatpush3.bf16.msra.mxu1 %v1438_v18  ;;  %1681 = vmatprep.mubr.msk.f32.mxu1 %vm1844_vm9, %v1842_v11 }
 0x5bc   :  { %1766 = vmatprep.subr.bf16.mxu1 %v1843_v2 }
 0x5bf   :  { %1768 = vmatpush3.bf16.msra.mxu1 %v1464_v21 }
 0x5c0   :  { %1769 = vmatprep.subr.bf16.mxu1 %v1843_v2 }
 0x5c3   :  { %1771 = vmatpush3.bf16.msra.mxu1 %v1465_v23 }
 0x5c4   :  { %1772 = vmatprep.subr.bf16.mxu1 %v1843_v2 }
 0x5c7   :  { %1774 = vmatpush3.bf16.msra.mxu1 %v1466_v25 }
 0x68d   :  { %v1110_v11 = vpop.f32.mrb[8].mxu1 }
 0x68e   :  { %v1184_v27 = vadd.f32 %v1183_v22, %v1110_v11  ;;  %v1653_v28 = vpop.f32.mrb[9].mxu1 }
 0x690   :  { %v1194_v29 = vadd.f32 %v1354_v26, %v1184_v27 }
 0x692   :  { %v1195_v30 = vmax.f32 %v1194_v29, 0.0 }
 0x694   :  { %1682 = vmatmul.mubr.msk.f32.vlgmr.msra.gmra.mrb[10].mxu1 %vm569_vm7, %v1195_v30 }
 0x695   :  { %1804 = shalt.err (!%p1801_p4)
}
 0x696   :  { %s1805_s18 = scalar_lea.hbm %s2172_s22, 256 }
 0x697   :  { %p1806_p5 = scmp.ne.s32.totalorder %s2172_s22, %s1805_s18  ;;  %p1809_p6 = scmp.lt.u32.totalorder %s1805_s18, %s2172_s22 }
 0x699   :  { %p1811_p7 = pnand %p1809_p6, %p1806_p5 }
 0x69b   :  { %1814 = shalt.err (!%p1811_p7)
}
 0x69c   :  { %s1846_s24 = smov 128   ;;  %s1847_s6 = smov 8   ;;  %v1355_v31 = vld [vmem:[%s2170_s20] ss:$0 sm:$0xff] }
 0x69d   :  { %1314 = dma.vmem_to_hbm [thread:$0]  %s1309_s0, 256, %s2172_s22, [#allocation5], %s1846_s24, %s1846_s24, %s1847_s6  }
 0x69e   :  { %s1848_s15 = smov [#allocation2]  }
 0x69f   :  { %s1299_s26 = sshll.u32 %s1848_s15, 4  ;;  %s1300_s26 = int_to_ptr.vmem [resolvable:$true] %s1299_s26 }
 0x6a0   :  { %s1815_s2 = scalar_lea.vmem %s1300_s26, 128  ;;  %p1820_p9 = scmp.lt.s32.totalorder %s1300_s26, %s1300_s26 }
 0x6a1   :  { %p1816_p8 = scmp.ne.s32.totalorder %s1300_s26, %s1815_s2  ;;  %p1821_p10 = scmp.lt.s32.totalorder %s1815_s2, %s1815_s2 }
 0x6a3   :  { %p1822_p11 = por %p1821_p10, %p1820_p9 }
 0x6a5   :  { %p1823_p12 = pnand %p1822_p11, %p1816_p8 }
 0x767   :  { %v1288_v32 = vpop.f32.mrb[10].mxu1 }
 0x768   :  { %v1289_v33 = vadd.f32 %v1355_v31, %v1288_v32  ;;  %v1683_v34 = vpop.f32.mrb[11].mxu1 }
 0x76a   :  { %1292 = vst.msk [vmem:[#allocation2] sm:$0xff] %vm284_vm5, %v1289_v33 }
 0x76b   :  { %1826 = shalt.err (!%p1823_p12)
}
 0x76c   :  { %s1827_s11 = scalar_lea.hbm %s2171_s21, 128 }
 0x76d   :  { %p1828_p13 = scmp.ne.s32.totalorder %s2171_s21, %s1827_s11  ;;  %p1831_p0 = scmp.lt.u32.totalorder %s1827_s11, %s2171_s21 }
 0x76f   :  { %p1833_p1 = pnand %p1831_p0, %p1828_p13 }
 0x771   :  { %1836 = shalt.err (!%p1833_p1)
}
 0x772   :  { %1302 = dma.vmem_to_hbm [thread:$0]  %s1300_s26, 128, %s2171_s21, [#allocation3]  }
 0x773   :  { %1837 = dma.done.wait [#allocation3], 128  }
 0x774   :  { %1838 = vsyncadd [#allocation3], 4294967168 }
 0x775   :  { %1839 = dma.done.wait [#allocation5], 256  }
 0x776   :  { %1840 = vsyncadd [#allocation5], 4294967040 }
 0x777   :  { %1321 = vsyncpa [#allocation3], 1 }
 0x778   :  { %1322 = vsyncpa [#allocation5], 1 }

</bundles_post_ra>
